<compile_context>
chip_gen: v6e
topology: v6e:2x2x1
jax: 0.10.0
libtpu: 0.0.40
codegen_flags: <defaults>
</compile_context>

<pallas_src>
import functools

import numpy as np
import jax
import jax.numpy as jnp
from jax.experimental import pallas as pl
from jax.experimental.pallas import tpu as pltpu

LANE = 128      # vreg lane width    -> hidden padded to a multiple of this
SUBLANE = 8     # vreg sublane width -> batch padded to a multiple of this


def _round_up(x, m):
    return (x + m - 1) // m * m


# -----------------------------------------------------------------------------
# Fused dual projection kernel:  o1 = x @ w1 + b1,  o2 = x @ w2 + b2
# Used for (a) the hoisted fwd/bwd LSTM input projections and (b) the fused
# key/value projections.  Row-tiled ("parallel" grid), bf16 MXU, f32 accumulate.
# -----------------------------------------------------------------------------
def _dual_linear_kernel(x_ref, w1_ref, b1_ref, w2_ref, b2_ref, o1_ref, o2_ref):
    x = x_ref[...]
    o1_ref[...] = (jnp.dot(x, w1_ref[...], preferred_element_type=jnp.float32)
                   + b1_ref[...]).astype(o1_ref.dtype)
    o2_ref[...] = (jnp.dot(x, w2_ref[...], preferred_element_type=jnp.float32)
                   + b2_ref[...]).astype(o2_ref.dtype)


def dual_linear(x2d, w1, b1, w2, b2, tile_rows=256):
    """x2d: (N, Din) -> ((N, D1) f32, (N, D2) f32)."""
    n, din = x2d.shape
    d1, d2 = w1.shape[1], w2.shape[1]
    tile = min(tile_rows, _round_up(n, SUBLANE))
    n_pad = _round_up(n, tile)
    x_p = x2d if n_pad == n else jnp.pad(x2d, ((0, n_pad - n), (0, 0)))
    x_p = x_p.astype(jnp.bfloat16)
    o1, o2 = pl.pallas_call(
        _dual_linear_kernel,
        out_shape=(jax.ShapeDtypeStruct((n_pad, d1), jnp.float32),
                   jax.ShapeDtypeStruct((n_pad, d2), jnp.float32)),
        grid=(n_pad // tile,),
        in_specs=[
            pl.BlockSpec((tile, din), lambda i: (i, 0)),   # activation rows
            pl.BlockSpec((din, d1), lambda i: (0, 0)),     # w1 (resident)
            pl.BlockSpec((1, d1), lambda i: (0, 0)),       # b1
            pl.BlockSpec((din, d2), lambda i: (0, 0)),     # w2 (resident)
            pl.BlockSpec((1, d2), lambda i: (0, 0)),       # b2
        ],
        out_specs=(pl.BlockSpec((tile, d1), lambda i: (i, 0)),
                   pl.BlockSpec((tile, d2), lambda i: (i, 0))),
        compiler_params=pltpu.CompilerParams(
            dimension_semantics=("parallel",)),
    )(x_p, w1.astype(jnp.bfloat16), b1.reshape(1, d1).astype(jnp.float32),
      w2.astype(jnp.bfloat16), b2.reshape(1, d2).astype(jnp.float32))
    return o1[:n], o2[:n]


# -----------------------------------------------------------------------------
# Fused bidirectional LSTM recurrence.
# Inputs are PRE-PROJECTED gates (x @ W_ih + b) for both directions; the kernel
# only does the serial part: gates += h @ W_hh, nonlinearities, state update.
# Grid iterates over blocks of TBLK timesteps; (h, c) state lives in VMEM
# scratch across grid steps.  W_hh / lengths use constant index maps (DMA once).
# -----------------------------------------------------------------------------
def _bilstm_rec_kernel(len_ref, gin_f_ref, gin_b_ref, whh_f_ref, whh_b_ref,
                       yf_ref, yb_ref, hf, cf, hb, cb, *, hp, tblk, t_pad):
    i = pl.program_id(0)

    @pl.when(i == 0)
    def _():
        hf[...] = jnp.zeros_like(hf)
        cf[...] = jnp.zeros_like(cf)
        hb[...] = jnp.zeros_like(hb)
        cb[...] = jnp.zeros_like(cb)

    lens = len_ref[...]                                   # (Bp, 1) int32

    def cell(g, h, c, valid):
        i_g = jax.nn.sigmoid(g[:, 0 * hp:1 * hp])
        f_g = jax.nn.sigmoid(g[:, 1 * hp:2 * hp])
        g_g = jnp.tanh(g[:, 2 * hp:3 * hp])
        o_g = jax.nn.sigmoid(g[:, 3 * hp:4 * hp])
        c_new = f_g * c + i_g * g_g
        h_new = o_g * jnp.tanh(c_new)
        return (jnp.where(valid, h_new, h),
                jnp.where(valid, c_new, c),
                jnp.where(valid, h_new, 0.0))

    h_f, c_f = hf[...], cf[...]
    h_b, c_b = hb[...], cb[...]

    # Fully unrolled time-block loop (static indices; long straight-line
    # region for the VLIW scheduler, amortizes per-grid-step overhead).
    for j in range(tblk):
        t_f = i * tblk + j                                # forward time idx
        t_b = t_pad - 1 - t_f                             # backward time idx
        g_f = gin_f_ref[j] + jnp.dot(h_f.astype(jnp.bfloat16), whh_f_ref[...],
                                     preferred_element_type=jnp.float32)
        g_b = gin_b_ref[tblk - 1 - j] + jnp.dot(
            h_b.astype(jnp.bfloat16), whh_b_ref[...],
            preferred_element_type=jnp.float32)
        h_f, c_f, y_f = cell(g_f, h_f, c_f, t_f < lens)
        h_b, c_b, y_b = cell(g_b, h_b, c_b, t_b < lens)
        yf_ref[j] = y_f.astype(yf_ref.dtype)
        yb_ref[tblk - 1 - j] = y_b.astype(yb_ref.dtype)

    hf[...] = h_f
    cf[...] = c_f
    hb[...] = h_b
    cb[...] = c_b


def _lstm_recurrent(lens_col, gin_f, gin_b, whh_f, whh_b, hp, tblk):
    t_pad, bp, g4 = gin_f.shape
    nb = t_pad // tblk
    kernel = functools.partial(_bilstm_rec_kernel, hp=hp, tblk=tblk, t_pad=t_pad)
    # NOTE: for large hidden sizes set
    # pltpu.CompilerParams(vmem_limit_bytes=...) appropriately (esp. v7x 64MiB).
    return pl.pallas_call(
        kernel,
        out_shape=(jax.ShapeDtypeStruct((t_pad, bp, hp), jnp.float32),
                   jax.ShapeDtypeStruct((t_pad, bp, hp), jnp.float32)),
        grid=(nb,),
        in_specs=[
            pl.BlockSpec((bp, 1), lambda i: (0, 0)),                     # lengths
            pl.BlockSpec((tblk, bp, g4), lambda i: (i, 0, 0)),           # fwd gates
            pl.BlockSpec((tblk, bp, g4), lambda i: (nb - 1 - i, 0, 0)),  # bwd gates
            pl.BlockSpec((hp, g4), lambda i: (0, 0)),                    # W_hh fwd
            pl.BlockSpec((hp, g4), lambda i: (0, 0)),                    # W_hh bwd
        ],
        out_specs=(pl.BlockSpec((tblk, bp, hp), lambda i: (i, 0, 0)),
                   pl.BlockSpec((tblk, bp, hp), lambda i: (nb - 1 - i, 0, 0))),
        scratch_shapes=[pltpu.VMEM((bp, hp), jnp.float32)] * 4,  # h_f c_f h_b c_b
        compiler_params=pltpu.CompilerParams(
            dimension_semantics=("arbitrary",)),
    )(lens_col, gin_f, gin_b, whh_f, whh_b)


def _bilstm_tm(x_tm, lengths, lp, hp, tblk):
    """Bidirectional LSTM over time-major padded input (T, Bp, Cin).

    Returns (T, Bp, 2*hp) f32 with [fwd hp | bwd hp] channel layout
    (padded hidden columns are exactly zero)."""
    t, bp, cin = x_tm.shape
    t_pad = _round_up(t, tblk)
    if t_pad != t:
        x_tm = jnp.pad(x_tm, ((0, t_pad - t), (0, 0), (0, 0)))

    # Hoisted input projection for both directions (bias folded in).
    x2d = x_tm.reshape(t_pad * bp, cin)
    gin_f, gin_b = dual_linear(x2d,
                               lp["fwd"]["w_ih_p"], lp["fwd"]["b_p"],
                               lp["bwd"]["w_ih_p"], lp["bwd"]["b_p"])
    gin_f = gin_f.reshape(t_pad, bp, 4 * hp)
    gin_b = gin_b.reshape(t_pad, bp, 4 * hp)

    lens_np = np.zeros((bp, 1), np.int32)
    lens_np[:len(lengths), 0] = np.asarray(lengths, np.int32)
    lens_col = jnp.asarray(lens_np)

    y_f, y_b = _lstm_recurrent(lens_col, gin_f, gin_b,
                               lp["fwd"]["w_hh_p"].astype(jnp.bfloat16),
                               lp["bwd"]["w_hh_p"].astype(jnp.bfloat16),
                               hp, tblk)
    y = jnp.concatenate([y_f, y_b], axis=-1)          # (t_pad, Bp, 2*hp)
    return y[:t]


# -----------------------------------------------------------------------------
# Parameter init (PyTorch-style uniform) + padding to lane/sublane tiles.
# Zero-padding keeps padded hidden units identically zero through the LSTM.
# -----------------------------------------------------------------------------
def _pad_gates(a, h, hp):
    """Pad last axis 4h -> 4hp (per i/f/g/o gate block)."""
    lead = a.shape[:-1]
    a = a.reshape(lead + (4, h))
    a = jnp.pad(a, [(0, 0)] * len(lead) + [(0, 0), (0, hp - h)])
    return a.reshape(lead + (4 * hp,))


def _pad_row_blocks(w, nblk, h, hp):
    """Pad rows (nblk*h, c) -> (nblk*hp, c), zero rows inserted per block."""
    c = w.shape[1]
    w = w.reshape(nblk, h, c)
    w = jnp.pad(w, ((0, 0), (0, hp - h), (0, 0)))
    return w.reshape(nblk * hp, c)


def _init_lstm_dir(key, in_dim, hidden):
    k1, k2, k3, k4 = jax.random.split(key, 4)
    s = 1.0 / np.sqrt(hidden)
    w_ih = jax.random.uniform(k1, (in_dim, 4 * hidden), jnp.float32, -s, s)
    w_hh = jax.random.uniform(k2, (hidden, 4 * hidden), jnp.float32, -s, s)
    b_ih = jax.random.uniform(k3, (4 * hidden,), jnp.float32, -s, s)
    b_hh = jax.random.uniform(k4, (4 * hidden,), jnp.float32, -s, s)
    return w_ih, w_hh, b_ih + b_hh


def init_encoder_params(key, input_dim, hidden, attn_dim, n_pblstm):
    hp = _round_up(hidden, LANE)
    keys = jax.random.split(key, 2 + n_pblstm)

    def make_dir(k, in_dim, n_in_blocks):
        w_ih, w_hh, b = _init_lstm_dir(k, in_dim, hidden)
        if n_in_blocks > 0:   # input channels are n_in_blocks hidden-blocks
            w_ih = _pad_row_blocks(w_ih, n_in_blocks, hidden, hp)
        return dict(w_ih_p=_pad_gates(w_ih, hidden, hp),
                    w_hh_p=_pad_gates(_pad_row_blocks(w_hh, 1, hidden, hp),
                                      hidden, hp),
                    b_p=_pad_gates(b, hidden, hp))

    def make_bidir(k, in_dim, n_in_blocks):
        kf, kb = jax.random.split(k)
        return dict(fwd=make_dir(kf, in_dim, n_in_blocks),
                    bwd=make_dir(kb, in_dim, n_in_blocks))

    params = {"first": make_bidir(keys[0], input_dim, 0)}
    params["pblstm"] = [make_bidir(keys[1 + i], 4 * hidden, 4)
                        for i in range(n_pblstm)]

    sk = 1.0 / np.sqrt(2 * hidden)
    kk, kv = jax.random.split(keys[-1])
    kk1, kk2 = jax.random.split(kk)
    kv1, kv2 = jax.random.split(kv)
    key_w = jax.random.uniform(kk1, (2 * hidden, attn_dim), jnp.float32, -sk, sk)
    val_w = jax.random.uniform(kv1, (2 * hidden, attn_dim), jnp.float32, -sk, sk)
    params["key_w_p"] = _pad_row_blocks(key_w, 2, hidden, hp)
    params["key_b"] = jax.random.uniform(kk2, (attn_dim,), jnp.float32, -sk, sk)
    params["val_w_p"] = _pad_row_blocks(val_w, 2, hidden, hp)
    params["val_b"] = jax.random.uniform(kv2, (attn_dim,), jnp.float32, -sk, sk)
    return params


# -----------------------------------------------------------------------------
# Encoder forward (eval mode)
# -----------------------------------------------------------------------------
def encoder_forward(params, x, lengths, hidden, tblk=8):
    """
    x: (B, T, Cin) padded, lengths: host numpy int array (B,)
    returns k: (B, Te, A), v: (B, Te, A), lengths_out
    """
    lengths = np.asarray(lengths)
    B, T, _ = x.shape
    hp = _round_up(hidden, LANE)
    bp = _round_up(B, SUBLANE)
    attn = params["key_b"].shape[0]

    # one transpose to time-major; batch padded to sublane multiple
    x_tm = jnp.transpose(x, (1, 0, 2)).astype(jnp.float32)   # (T, B, Cin)
    if bp != B:
        x_tm = jnp.pad(x_tm, ((0, 0), (0, bp - B), (0, 0)))

    # LockedDropOut is identity in eval mode.
    cur_lengths = lengths
    h_tm = _bilstm_tm(x_tm, cur_lengths, params["first"], hp, tblk)  # (T, Bp, 2hp)

    for lp in params["pblstm"]:
        tcur = h_tm.shape[0]
        if tcur % 2 == 1:                                    # drop odd frame
            h_tm = h_tm[:-1]
            tcur -= 1
        cur_lengths = cur_lengths // 2
        # time-major fold of time pairs into channels: (t, Bp, 2hp)->(t/2, Bp, 4hp)
        h_tm = jnp.concatenate([h_tm[0::2], h_tm[1::2]], axis=-1)
        h_tm = _bilstm_tm(h_tm, cur_lengths, lp, hp, tblk)
        h_tm = h_tm[:int(cur_lengths.max())]                 # pad_packed trunc

    te = h_tm.shape[0]
    flat = h_tm.reshape(te * bp, 2 * hp)
    # fused key/value projections: one pass over the final activations
    k2d, v2d = dual_linear(flat, params["key_w_p"], params["key_b"],
                           params["val_w_p"], params["val_b"])
    k = jnp.transpose(k2d.reshape(te, bp, attn)[:, :B], (1, 0, 2))
    v = jnp.transpose(v2d.reshape(te, bp, attn)[:, :B], (1, 0, 2))
    return k, v, cur_lengths


# -----------------------------------------------------------------------------
if __name__ == "__main__":
    # small ParamsHW4-like config
    B, T, C_IN = 2, 16, 8          # x: (B, Tin, input_dims[0])
    HIDDEN = 16                    # hidden_encoder
    ATTN = 16                      # attention_dim
    N_PBLSTM = 2                   # layer_encoder
    TBLK = 8                       # timesteps per grid step

    root = jax.random.PRNGKey(0)
    kp, kx = jax.random.split(root)
    params = init_encoder_params(kp, C_IN, HIDDEN, ATTN, N_PBLSTM)

    x = jax.random.normal(kx, (B, T, C_IN), jnp.float32)
    lengths = np.array([16, 12], dtype=np.int64)
    # zero the padded region, like a padded batch from collate
    t_idx = np.arange(T)[None, :, None]
    x = x * jnp.asarray(t_idx < lengths[:, None, None], jnp.float32)

    k, v, lengths_out = encoder_forward(params, x, lengths, HIDDEN, tblk=TBLK)
    jax.block_until_ready(k)
    jax.block_until_ready(v)

    assert k.shape == (B, T // (2 ** N_PBLSTM), ATTN), k.shape
    assert v.shape == (B, T // (2 ** N_PBLSTM), ATTN), v.shape
    assert list(lengths_out) == [4, 3], lengths_out
    print("KERNEL_OK")
</pallas_src>

<mosaic_0001>
module attributes {stable_mosaic.version = 11 : i64} {
  func.func @_dual_linear_kernel(%arg0: i32, %arg1: memref<128x8xbf16, #tpu.memory_space<vmem>>, %arg2: memref<8x512xbf16, #tpu.memory_space<vmem>>, %arg3: memref<1x512xf32, #tpu.memory_space<vmem>>, %arg4: memref<8x512xbf16, #tpu.memory_space<vmem>>, %arg5: memref<1x512xf32, #tpu.memory_space<vmem>>, %arg6: memref<128x512xf32, #tpu.memory_space<vmem>>, %arg7: memref<128x512xf32, #tpu.memory_space<vmem>>) attributes {dimension_semantics = [#tpu.dimension_semantics<parallel>], iteration_bounds = array<i64: 1>, scalar_prefetch = 0 : i64, scratch_operands = 0 : i64, tpu.core_type = #tpu.core_type<tc>, window_params = [{transform_indices = @transform_0, window_bounds = array<i64: 128, 8>}, {pipeline_mode = #tpu.pipeline_mode<synchronous>, transform_indices = @transform_1, window_bounds = array<i64: 8, 512>}, {pipeline_mode = #tpu.pipeline_mode<synchronous>, transform_indices = @transform_2, window_bounds = array<i64: 1, 512>}, {pipeline_mode = #tpu.pipeline_mode<synchronous>, transform_indices = @transform_3, window_bounds = array<i64: 8, 512>}, {pipeline_mode = #tpu.pipeline_mode<synchronous>, transform_indices = @transform_4, window_bounds = array<i64: 1, 512>}, {transform_indices = @transform_5, window_bounds = array<i64: 128, 512>}, {transform_indices = @transform_6, window_bounds = array<i64: 128, 512>}]} {
    %c0 = arith.constant 0 : index
    %c0_0 = arith.constant 0 : index
    %0 = vector.load %arg1[%c0, %c0_0] : memref<128x8xbf16, #tpu.memory_space<vmem>>, vector<128x8xbf16>
    %c0_1 = arith.constant 0 : index
    %c0_2 = arith.constant 0 : index
    %1 = vector.load %arg2[%c0_1, %c0_2] : memref<8x512xbf16, #tpu.memory_space<vmem>>, vector<8x512xbf16>
    %cst = arith.constant dense<0.000000e+00> : vector<128x512xf32>
    %2 = tpu.matmul %0, %1, %cst {dimension_numbers = #tpu.dot_dimension_numbers<[1], [0], [0], [1], [0, 0, 1, 1], [], []>} : vector<128x8xbf16>, vector<8x512xbf16>, vector<128x512xf32> -> vector<128x512xf32>
    %c0_3 = arith.constant 0 : index
    %c0_4 = arith.constant 0 : index
    %3 = vector.load %arg3[%c0_3, %c0_4] : memref<1x512xf32, #tpu.memory_space<vmem>>, vector<1x512xf32>
    %4 = vector.broadcast %3 : vector<1x512xf32> to vector<128x512xf32>
    %5 = arith.addf %2, %4 : vector<128x512xf32>
    %c0_5 = arith.constant 0 : index
    %c0_6 = arith.constant 0 : index
    %6 = vector.load %arg6[%c0_5, %c0_6] : memref<128x512xf32, #tpu.memory_space<vmem>>, vector<128x512xf32>
    tpu.vector_store %arg6[%c0_5, %c0_6], %5 {strides = array<i32>} : memref<128x512xf32, #tpu.memory_space<vmem>>, vector<128x512xf32>,
    %c0_7 = arith.constant 0 : index
    %c0_8 = arith.constant 0 : index
    %7 = vector.load %arg4[%c0_7, %c0_8] : memref<8x512xbf16, #tpu.memory_space<vmem>>, vector<8x512xbf16>
    %cst_9 = arith.constant dense<0.000000e+00> : vector<128x512xf32>
    %8 = tpu.matmul %0, %7, %cst_9 {dimension_numbers = #tpu.dot_dimension_numbers<[1], [0], [0], [1], [0, 0, 1, 1], [], []>} : vector<128x8xbf16>, vector<8x512xbf16>, vector<128x512xf32> -> vector<128x512xf32>
    %c0_10 = arith.constant 0 : index
    %c0_11 = arith.constant 0 : index
    %9 = vector.load %arg5[%c0_10, %c0_11] : memref<1x512xf32, #tpu.memory_space<vmem>>, vector<1x512xf32>
    %10 = vector.broadcast %9 : vector<1x512xf32> to vector<128x512xf32>
    %11 = arith.addf %8, %10 : vector<128x512xf32>
    %c0_12 = arith.constant 0 : index
    %c0_13 = arith.constant 0 : index
    %12 = vector.load %arg7[%c0_12, %c0_13] : memref<128x512xf32, #tpu.memory_space<vmem>>, vector<128x512xf32>
    tpu.vector_store %arg7[%c0_12, %c0_13], %11 {strides = array<i32>} : memref<128x512xf32, #tpu.memory_space<vmem>>, vector<128x512xf32>,
    return
  }
  func.func @transform_0(%arg0: i32) -> (i32, i32) {
    %c0_i32 = arith.constant 0 : i32
    %c0_i32_0 = arith.constant 0 : i32
    return %arg0, %c0_i32 : i32, i32
  }
  func.func @transform_1(%arg0: i32) -> (i32, i32) {
    %c0_i32 = arith.constant 0 : i32
    %c0_i32_0 = arith.constant 0 : i32
    %c0_i32_1 = arith.constant 0 : i32
    return %c0_i32, %c0_i32_0 : i32, i32
  }
  func.func @transform_2(%arg0: i32) -> (i32, i32) {
    %c0_i32 = arith.constant 0 : i32
    %c0_i32_0 = arith.constant 0 : i32
    %c0_i32_1 = arith.constant 0 : i32
    return %c0_i32, %c0_i32_0 : i32, i32
  }
  func.func @transform_3(%arg0: i32) -> (i32, i32) {
    %c0_i32 = arith.constant 0 : i32
    %c0_i32_0 = arith.constant 0 : i32
    %c0_i32_1 = arith.constant 0 : i32
    return %c0_i32, %c0_i32_0 : i32, i32
  }
  func.func @transform_4(%arg0: i32) -> (i32, i32) {
    %c0_i32 = arith.constant 0 : i32
    %c0_i32_0 = arith.constant 0 : i32
    %c0_i32_1 = arith.constant 0 : i32
    return %c0_i32, %c0_i32_0 : i32, i32
  }
  func.func @transform_5(%arg0: i32) -> (i32, i32) {
    %c0_i32 = arith.constant 0 : i32
    %c0_i32_0 = arith.constant 0 : i32
    return %arg0, %c0_i32 : i32, i32
  }
  func.func @transform_6(%arg0: i32) -> (i32, i32) {
    %c0_i32 = arith.constant 0 : i32
    %c0_i32_0 = arith.constant 0 : i32
    return %arg0, %c0_i32 : i32, i32
  }
}

</mosaic_0001>

<bundles_post_ra>
// kernel: tpu_custom_call.1
= control target key start
LH: loop header
LB: loop body
LE: loop exit
PB: predicated region body
PF: predicated region fallthrough
CT: control target
= control target key end

     0   :  { %12 = vsyncpa [#allocation3], 0  ;;  %vm140_vm0 = vcmask 1043456   ;;  %v928_v6 = vmov 0   ;;  %vm115_vm1 = vcmask 64512   ;;  %s1260_s0 = inlined_call_operand.vmem [shape: bf16[128,8], index: 0, kind: input, shape index: {}]   ;;  %s1261_s1 = inlined_call_operand.vmem [shape: bf16[8,512], index: 1, kind: input, shape index: {}]   ;;  %s1262_s2 = inlined_call_operand.vmem [shape: f32[1,512], index: 2, kind: input, shape index: {}]   ;;  %s1263_s3 = inlined_call_operand.vmem [shape: bf16[8,512], index: 3, kind: input, shape index: {}]   ;;  %s1264_s4 = inlined_call_operand.vmem [shape: f32[1,512], index: 4, kind: input, shape index: {}]   ;;  %s1265_s5 = inlined_call_operand.hbm [shape: f32[128,512], index: 5, kind: output, shape index: {0}]   ;;  %s1266_s6 = inlined_call_operand.hbm [shape: f32[128,512], index: 6, kind: output, shape index: {1}]  }
   0x1   :  { %v41_v0 = vld [vmem:[%s1261_s1] sm:$0xff]  ;;  %v42_v1 = vld [vmem:[%s1261_s1 + $0x8] sm:$0xff]  ;;  %185 = vmatprep.mubr.bf16.mxu0 %v928_v6  ;;  %298 = vmatprep.mubr.bf16.mxu1 %v928_v6 }
   0x2   :  { %v820_v2 = vcombine.high %v41_v0, %v41_v0  ;;  %v822_v3 = vcombine.high %v42_v1, %v42_v1  ;;  %v819_v4 = vcombine.low %v41_v0, %v41_v0  ;;  %v821_v5 = vcombine.low %v42_v1, %v42_v1  ;;  %v443_v7 = vld [vmem:[%s1263_s3] sm:$0xff]  ;;  %v444_v9 = vld [vmem:[%s1263_s3 + $0x8] sm:$0xff] }
   0x3   :  { %v842_v8 = vcombine.high %v443_v7, %v443_v7  ;;  %v841_v10 = vcombine.low %v443_v7, %v443_v7  ;;  %v872_v13 = vld [vmem:[%s1260_s0] sm:$0xff]   ;;  %v844_v14 = vcombine.high %v444_v9, %v444_v9  ;;  %v843_v15 = vcombine.low %v444_v9, %v444_v9 }
   0x4   :  { %823 = vmatprep.subr.msk.bf16.mxu0 %vm140_vm0, %v820_v2  ;;  %832 = vmatprep.subr.msk.bf16.mxu1 %vm140_vm0, %v822_v3  ;;  %v142_v11 = vsel %vm140_vm0, %v819_v4, 0  ;;  %v148_v12 = vsel %vm140_vm0, %v821_v5, 0 }
   0x5   :  { %168 = vmatpush1.bf16.msra.mxu0 %v142_v11  ;;  %281 = vmatpush1.bf16.msra.mxu1 %v148_v12  ;;  %v478_v16 = vsel %vm140_vm0, %v841_v10, 0  ;;  %v484_v17 = vsel %vm140_vm0, %v843_v15, 0 }
   0x6   :  { %845 = vmatprep.subr.msk.bf16.mxu0 %vm140_vm0, %v842_v8  ;;  %854 = vmatprep.subr.msk.bf16.mxu1 %vm140_vm0, %v844_v14 }
   0x8   :  { %824 = vmatmul.mubr.msk.bf16.vlgmr.msra.gmra.mxu0 %vm115_vm1, %v872_v13  ;;  %833 = vmatmul.mubr.msk.bf16.vlgmr.msra.gmra.mxu1 %vm115_vm1, %v872_v13 }
   0x9   :  { %504 = vmatpush1.bf16.msra.mxu0 %v478_v16  ;;  %617 = vmatpush1.bf16.msra.mxu1 %v484_v17 }
   0xa   :  { %195 = vmatprep.mubr.bf16.mxu0 %v928_v6  ;;  %308 = vmatprep.mubr.bf16.mxu1 %v928_v6 }
   0xb   :  { %13 = vsyncpa [#allocation5], 0  ;;  %v877_v18 = vld [vmem:[%s1260_s0 + $0x8] sm:$0xff]   ;;  %v878_v19 = vld [vmem:[%s1260_s0 + $0x10] sm:$0xff]   ;;  %v45_v25 = vlaneseq  ;;  %s929_s21 = smov [#allocation2]  }
   0xc   :  { %v879_v20 = vld [vmem:[%s1260_s0 + $0x18] sm:$0xff]   ;;  %v880_v21 = vld [vmem:[%s1260_s0 + $0x20] sm:$0xff]   ;;  %v881_v22 = vld [vmem:[%s1260_s0 + $0x28] sm:$0xff]   ;;  %s784_s22 = sshll.u32 %s929_s21, 4  ;;  %s785_s22 = int_to_ptr.vmem [resolvable:$true] %s784_s22 }
   0xd   :  { %v882_v23 = vld [vmem:[%s1260_s0 + $0x30] sm:$0xff]   ;;  %v883_v24 = vld [vmem:[%s1260_s0 + $0x38] sm:$0xff]   ;;  %v1076_v26 = vshrl.u32 %v45_v25, 7  ;;  %v43_v29 = vld [vmem:[%s1262_s2] sm:$0xf]  ;;  %p889_p1 = scmp.lt.s32.totalorder %s785_s22, %s785_s22 }
   0xf   :  { %v47_v27 = vsub.s32 0, %v1076_v26  ;;  %v55_v28 = vsub.s32 2, %v1076_v26  ;;  %v51_v30 = vsub.s32 1, %v1076_v26  ;;  %v59_v31 = vsub.s32 3, %v1076_v26 }
  0x10   :  { %825 = vmatmul.mubr.msk.bf16.gmra.mxu0 %vm115_vm1, %v877_v18  ;;  %834 = vmatmul.mubr.msk.bf16.gmra.mxu1 %vm115_vm1, %v877_v18 }
  0x11   :  { %205 = vmatprep.mubr.bf16.mxu0 %v928_v6  ;;  %318 = vmatprep.mubr.bf16.mxu1 %v928_v6  ;;  %v1087_v32 = vrot.slane %v43_v29, %v47_v27  ;;  %v1091_v33 = vrot.slane %v43_v29, %v55_v28  ;;  %v1095_v34 = vrot.slane %v43_v29, %v51_v30 }
  0x12   :  { %v1099_v35 = vrot.slane %v43_v29, %v59_v31 }
  0x18   :  { %826 = vmatmul.mubr.msk.bf16.gmra.mxu0 %vm115_vm1, %v878_v19  ;;  %835 = vmatmul.mubr.msk.bf16.gmra.mxu1 %vm115_vm1, %v878_v19 }
  0x19   :  { %215 = vmatprep.mubr.bf16.mxu0 %v928_v6  ;;  %328 = vmatprep.mubr.bf16.mxu1 %v928_v6 }
  0x20   :  { %827 = vmatmul.mubr.msk.bf16.gmra.mxu0 %vm115_vm1, %v879_v20  ;;  %836 = vmatmul.mubr.msk.bf16.gmra.mxu1 %vm115_vm1, %v879_v20 }
  0x21   :  { %225 = vmatprep.mubr.bf16.mxu0 %v928_v6  ;;  %338 = vmatprep.mubr.bf16.mxu1 %v928_v6 }
  0x28   :  { %828 = vmatmul.mubr.msk.bf16.gmra.mxu0 %vm115_vm1, %v880_v21  ;;  %837 = vmatmul.mubr.msk.bf16.gmra.mxu1 %vm115_vm1, %v880_v21 }
  0x29   :  { %235 = vmatprep.mubr.bf16.mxu0 %v928_v6  ;;  %348 = vmatprep.mubr.bf16.mxu1 %v928_v6 }
  0x30   :  { %829 = vmatmul.mubr.msk.bf16.gmra.mxu0 %vm115_vm1, %v881_v22  ;;  %838 = vmatmul.mubr.msk.bf16.gmra.mxu1 %vm115_vm1, %v881_v22 }
  0x31   :  { %245 = vmatprep.mubr.bf16.mxu0 %v928_v6  ;;  %358 = vmatprep.mubr.bf16.mxu1 %v928_v6 }
  0x38   :  { %830 = vmatmul.mubr.msk.bf16.gmra.mxu0 %vm115_vm1, %v882_v23  ;;  %839 = vmatmul.mubr.msk.bf16.gmra.mxu1 %vm115_vm1, %v882_v23 }
  0x39   :  { %255 = vmatprep.mubr.bf16.mxu0 %v928_v6  ;;  %368 = vmatprep.mubr.bf16.mxu1 %v928_v6 }
  0x40   :  { %831 = vmatmul.mubr.msk.bf16.gmra.mxu0 %vm115_vm1, %v883_v24  ;;  %840 = vmatmul.mubr.msk.bf16.gmra.mxu1 %vm115_vm1, %v883_v24 }
  0x41   :  { %521 = vmatprep.mubr.bf16.mxu0 %v928_v6  ;;  %634 = vmatprep.mubr.bf16.mxu1 %v928_v6 }
  0x48   :  { %846 = vmatmul.mubr.msk.bf16.vlgmr.msra.gmra.mxu0 %vm115_vm1, %v872_v13  ;;  %855 = vmatmul.mubr.msk.bf16.vlgmr.msra.gmra.mxu1 %vm115_vm1, %v872_v13 }
  0x49   :  { %531 = vmatprep.mubr.bf16.mxu0 %v928_v6  ;;  %644 = vmatprep.mubr.bf16.mxu1 %v928_v6 }
  0x50   :  { %847 = vmatmul.mubr.msk.bf16.gmra.mxu0 %vm115_vm1, %v877_v18  ;;  %856 = vmatmul.mubr.msk.bf16.gmra.mxu1 %vm115_vm1, %v877_v18 }
  0x51   :  { %541 = vmatprep.mubr.bf16.mxu0 %v928_v6  ;;  %654 = vmatprep.mubr.bf16.mxu1 %v928_v6 }
  0x58   :  { %848 = vmatmul.mubr.msk.bf16.gmra.mxu0 %vm115_vm1, %v878_v19  ;;  %857 = vmatmul.mubr.msk.bf16.gmra.mxu1 %vm115_vm1, %v878_v19 }
  0x59   :  { %551 = vmatprep.mubr.bf16.mxu0 %v928_v6  ;;  %664 = vmatprep.mubr.bf16.mxu1 %v928_v6 }
  0x60   :  { %849 = vmatmul.mubr.msk.bf16.gmra.mxu0 %vm115_vm1, %v879_v20  ;;  %858 = vmatmul.mubr.msk.bf16.gmra.mxu1 %vm115_vm1, %v879_v20 }
  0x61   :  { %561 = vmatprep.mubr.bf16.mxu0 %v928_v6  ;;  %674 = vmatprep.mubr.bf16.mxu1 %v928_v6 }
  0x68   :  { %850 = vmatmul.mubr.msk.bf16.gmra.mxu0 %vm115_vm1, %v880_v21  ;;  %859 = vmatmul.mubr.msk.bf16.gmra.mxu1 %vm115_vm1, %v880_v21 }
  0x69   :  { %571 = vmatprep.mubr.bf16.mxu0 %v928_v6  ;;  %684 = vmatprep.mubr.bf16.mxu1 %v928_v6 }
  0x70   :  { %851 = vmatmul.mubr.msk.bf16.gmra.mxu0 %vm115_vm1, %v881_v22  ;;  %860 = vmatmul.mubr.msk.bf16.gmra.mxu1 %vm115_vm1, %v881_v22 }
  0x71   :  { %581 = vmatprep.mubr.bf16.mxu0 %v928_v6  ;;  %694 = vmatprep.mubr.bf16.mxu1 %v928_v6 }
  0x78   :  { %852 = vmatmul.mubr.msk.bf16.gmra.mxu0 %vm115_vm1, %v882_v23  ;;  %861 = vmatmul.mubr.msk.bf16.gmra.mxu1 %vm115_vm1, %v882_v23 }
  0x79   :  { %591 = vmatprep.mubr.bf16.mxu0 %v928_v6  ;;  %704 = vmatprep.mubr.bf16.mxu1 %v928_v6 }
  0x80   :  { %853 = vmatmul.mubr.msk.bf16.gmra.mxu0 %vm115_vm1, %v883_v24  ;;  %862 = vmatmul.mubr.msk.bf16.gmra.mxu1 %vm115_vm1, %v883_v24 }
  0xc8   :  { %v187_v36 = vpop.f32.mrf.mxu0  ;;  %v300_v37 = vpop.f32.mrf.mxu1 }
  0xc9   :  { %v188_v38 = vadd.f32 %v187_v36, %v1087_v32  ;;  %v301_v39 = vadd.f32 %v300_v37, %v1091_v33 }
  0xca   :  { %v189_v40 = vpop.f32.mrf.mxu0  ;;  %v302_v41 = vpop.f32.mrf.mxu1 }
  0xcb   :  { %379 = vst [vmem:[#allocation2] sm:$0xff] %v188_v38  ;;  %381 = vst [vmem:[#allocation2 + $0x10] sm:$0xff] %v301_v39  ;;  %v190_v42 = vadd.f32 %v189_v40, %v1095_v34  ;;  %v303_v43 = vadd.f32 %v302_v41, %v1099_v35 }
  0xcc   :  { %v191_v44 = vpop.f32.mrf.mxu0  ;;  %v304_v45 = vpop.f32.mrf.mxu1 }
  0xcd   :  { %380 = vst [vmem:[#allocation2 + $0x8] sm:$0xff] %v190_v42  ;;  %382 = vst [vmem:[#allocation2 + $0x18] sm:$0xff] %v303_v43  ;;  %v192_v46 = vadd.f32 %v191_v44, %v1087_v32  ;;  %v305_v47 = vadd.f32 %v304_v45, %v1091_v33 }
  0xce   :  { %v193_v48 = vpop.f32.mrf.mxu0  ;;  %v306_v49 = vpop.f32.mrf.mxu1 }
  0xcf   :  { %383 = vst [vmem:[#allocation2 + $0x20] sm:$0xff] %v192_v46  ;;  %385 = vst [vmem:[#allocation2 + $0x30] sm:$0xff] %v305_v47  ;;  %v194_v50 = vadd.f32 %v193_v48, %v1095_v34  ;;  %v307_v51 = vadd.f32 %v306_v49, %v1099_v35 }
  0xd0   :  { %v197_v52 = vpop.f32.mrf.mxu0  ;;  %v310_v53 = vpop.f32.mrf.mxu1 }
  0xd1   :  { %384 = vst [vmem:[#allocation2 + $0x28] sm:$0xff] %v194_v50  ;;  %386 = vst [vmem:[#allocation2 + $0x38] sm:$0xff] %v307_v51  ;;  %v198_v54 = vadd.f32 %v197_v52, %v1087_v32  ;;  %v311_v55 = vadd.f32 %v310_v53, %v1091_v33 }
  0xd2   :  { %v199_v56 = vpop.f32.mrf.mxu0  ;;  %v312_v57 = vpop.f32.mrf.mxu1 }
  0xd3   :  { %387 = vst [vmem:[#allocation2 + $0x40] sm:$0xff] %v198_v54  ;;  %389 = vst [vmem:[#allocation2 + $0x50] sm:$0xff] %v311_v55  ;;  %v200_v58 = vadd.f32 %v199_v56, %v1095_v34  ;;  %v313_v59 = vadd.f32 %v312_v57, %v1099_v35 }
  0xd4   :  { %v201_v60 = vpop.f32.mrf.mxu0  ;;  %v314_v61 = vpop.f32.mrf.mxu1 }
  0xd5   :  { %388 = vst [vmem:[#allocation2 + $0x48] sm:$0xff] %v200_v58  ;;  %390 = vst [vmem:[#allocation2 + $0x58] sm:$0xff] %v313_v59  ;;  %v202_v62 = vadd.f32 %v201_v60, %v1087_v32  ;;  %v315_v63 = vadd.f32 %v314_v61, %v1091_v33 }
  0xd6   :  { %v203_v0 = vpop.f32.mrf.mxu0  ;;  %v316_v1 = vpop.f32.mrf.mxu1 }
  0xd7   :  { %391 = vst [vmem:[#allocation2 + $0x60] sm:$0xff] %v202_v62  ;;  %393 = vst [vmem:[#allocation2 + $0x70] sm:$0xff] %v315_v63  ;;  %v204_v2 = vadd.f32 %v203_v0, %v1095_v34  ;;  %v317_v3 = vadd.f32 %v316_v1, %v1099_v35 }
  0xd8   :  { %v207_v4 = vpop.f32.mrf.mxu0  ;;  %v320_v5 = vpop.f32.mrf.mxu1 }
  0xd9   :  { %392 = vst [vmem:[#allocation2 + $0x68] sm:$0xff] %v204_v2  ;;  %394 = vst [vmem:[#allocation2 + $0x78] sm:$0xff] %v317_v3  ;;  %v208_v6 = vadd.f32 %v207_v4, %v1087_v32  ;;  %v321_v7 = vadd.f32 %v320_v5, %v1091_v33 }
  0xda   :  { %v209_v8 = vpop.f32.mrf.mxu0  ;;  %v322_v9 = vpop.f32.mrf.mxu1 }
  0xdb   :  { %395 = vst [vmem:[#allocation2 + $0x80] sm:$0xff] %v208_v6  ;;  %397 = vst [vmem:[#allocation2 + $0x90] sm:$0xff] %v321_v7  ;;  %v210_v10 = vadd.f32 %v209_v8, %v1095_v34  ;;  %v323_v11 = vadd.f32 %v322_v9, %v1099_v35 }
  0xdc   :  { %v211_v12 = vpop.f32.mrf.mxu0  ;;  %v324_v13 = vpop.f32.mrf.mxu1 }
  0xdd   :  { %396 = vst [vmem:[#allocation2 + $0x88] sm:$0xff] %v210_v10  ;;  %398 = vst [vmem:[#allocation2 + $0x98] sm:$0xff] %v323_v11  ;;  %v212_v14 = vadd.f32 %v211_v12, %v1087_v32  ;;  %v325_v15 = vadd.f32 %v324_v13, %v1091_v33 }
  0xde   :  { %v213_v16 = vpop.f32.mrf.mxu0  ;;  %v326_v17 = vpop.f32.mrf.mxu1 }
  0xdf   :  { %399 = vst [vmem:[#allocation2 + $0xa0] sm:$0xff] %v212_v14  ;;  %401 = vst [vmem:[#allocation2 + $0xb0] sm:$0xff] %v325_v15  ;;  %v214_v18 = vadd.f32 %v213_v16, %v1095_v34  ;;  %v327_v19 = vadd.f32 %v326_v17, %v1099_v35 }
  0xe0   :  { %v217_v20 = vpop.f32.mrf.mxu0  ;;  %v330_v21 = vpop.f32.mrf.mxu1 }
  0xe1   :  { %400 = vst [vmem:[#allocation2 + $0xa8] sm:$0xff] %v214_v18  ;;  %402 = vst [vmem:[#allocation2 + $0xb8] sm:$0xff] %v327_v19  ;;  %v218_v22 = vadd.f32 %v217_v20, %v1087_v32  ;;  %v331_v23 = vadd.f32 %v330_v21, %v1091_v33 }
  0xe2   :  { %v219_v24 = vpop.f32.mrf.mxu0  ;;  %v332_v25 = vpop.f32.mrf.mxu1 }
  0xe3   :  { %403 = vst [vmem:[#allocation2 + $0xc0] sm:$0xff] %v218_v22  ;;  %405 = vst [vmem:[#allocation2 + $0xd0] sm:$0xff] %v331_v23  ;;  %v220_v29 = vadd.f32 %v219_v24, %v1095_v34  ;;  %v333_v36 = vadd.f32 %v332_v25, %v1099_v35 }
  0xe4   :  { %v221_v37 = vpop.f32.mrf.mxu0  ;;  %v334_v38 = vpop.f32.mrf.mxu1 }
  0xe5   :  { %404 = vst [vmem:[#allocation2 + $0xc8] sm:$0xff] %v220_v29  ;;  %406 = vst [vmem:[#allocation2 + $0xd8] sm:$0xff] %v333_v36  ;;  %v222_v39 = vadd.f32 %v221_v37, %v1087_v32  ;;  %v335_v40 = vadd.f32 %v334_v38, %v1091_v33 }
  0xe6   :  { %v223_v41 = vpop.f32.mrf.mxu0  ;;  %v336_v42 = vpop.f32.mrf.mxu1 }
  0xe7   :  { %407 = vst [vmem:[#allocation2 + $0xe0] sm:$0xff] %v222_v39  ;;  %409 = vst [vmem:[#allocation2 + $0xf0] sm:$0xff] %v335_v40  ;;  %v224_v43 = vadd.f32 %v223_v41, %v1095_v34  ;;  %v337_v44 = vadd.f32 %v336_v42, %v1099_v35 }
  0xe8   :  { %v227_v45 = vpop.f32.mrf.mxu0  ;;  %v340_v46 = vpop.f32.mrf.mxu1 }
  0xe9   :  { %408 = vst [vmem:[#allocation2 + $0xe8] sm:$0xff] %v224_v43  ;;  %410 = vst [vmem:[#allocation2 + $0xf8] sm:$0xff] %v337_v44  ;;  %v228_v47 = vadd.f32 %v227_v45, %v1087_v32  ;;  %v341_v48 = vadd.f32 %v340_v46, %v1091_v33  ;;  %v445_v44 = vld [vmem:[%s1264_s4] sm:$0xf]  ;;  %s884_s4 = scalar_lea.vmem %s785_s22, 8192 }
  0xea   :  { %v229_v49 = vpop.f32.mrf.mxu0  ;;  %v342_v50 = vpop.f32.mrf.mxu1  ;;  %p885_p0 = scmp.ne.s32.totalorder %s785_s22, %s884_s4  ;;  %p890_p2 = scmp.lt.s32.totalorder %s884_s4, %s884_s4 }
  0xeb   :  { %411 = vst [vmem:[#allocation2 + $0x100] sm:$0xff] %v228_v47  ;;  %413 = vst [vmem:[#allocation2 + $0x110] sm:$0xff] %v341_v48  ;;  %v230_v51 = vadd.f32 %v229_v49, %v1095_v34  ;;  %v343_v52 = vadd.f32 %v342_v50, %v1099_v35 }
  0xec   :  { %v231_v53 = vpop.f32.mrf.mxu0  ;;  %v344_v54 = vpop.f32.mrf.mxu1  ;;  %p891_p3 = por %p890_p2, %p889_p1 }
  0xed   :  { %412 = vst [vmem:[#allocation2 + $0x108] sm:$0xff] %v230_v51  ;;  %414 = vst [vmem:[#allocation2 + $0x118] sm:$0xff] %v343_v52  ;;  %v232_v55 = vadd.f32 %v231_v53, %v1087_v32  ;;  %v345_v56 = vadd.f32 %v344_v54, %v1091_v33  ;;  %v1168_v51 = vrot.slane %v445_v44, %v47_v27 }
  0xee   :  { %v233_v57 = vpop.f32.mrf.mxu0  ;;  %v346_v58 = vpop.f32.mrf.mxu1  ;;  %v1172_v52 = vrot.slane %v445_v44, %v55_v28  ;;  %v1182_v27 = vrot.slane %v445_v44, %v59_v31  ;;  %p892_p4 = pnand %p891_p3, %p885_p0 }
  0xef   :  { %415 = vst [vmem:[#allocation2 + $0x120] sm:$0xff] %v232_v55  ;;  %417 = vst [vmem:[#allocation2 + $0x130] sm:$0xff] %v345_v56  ;;  %v234_v59 = vadd.f32 %v233_v57, %v1095_v34  ;;  %v347_v60 = vadd.f32 %v346_v58, %v1099_v35 }
  0xf0   :  { %v237_v61 = vpop.f32.mrf.mxu0  ;;  %v350_v62 = vpop.f32.mrf.mxu1 }
  0xf1   :  { %416 = vst [vmem:[#allocation2 + $0x128] sm:$0xff] %v234_v59  ;;  %418 = vst [vmem:[#allocation2 + $0x138] sm:$0xff] %v347_v60  ;;  %v238_v63 = vadd.f32 %v237_v61, %v1087_v32  ;;  %v351_v0 = vadd.f32 %v350_v62, %v1091_v33 }
  0xf2   :  { %v239_v1 = vpop.f32.mrf.mxu0  ;;  %v352_v2 = vpop.f32.mrf.mxu1 }
  0xf3   :  { %419 = vst [vmem:[#allocation2 + $0x140] sm:$0xff] %v238_v63  ;;  %421 = vst [vmem:[#allocation2 + $0x150] sm:$0xff] %v351_v0  ;;  %v240_v3 = vadd.f32 %v239_v1, %v1095_v34  ;;  %v353_v4 = vadd.f32 %v352_v2, %v1099_v35 }
  0xf4   :  { %v241_v5 = vpop.f32.mrf.mxu0  ;;  %v354_v6 = vpop.f32.mrf.mxu1 }
  0xf5   :  { %420 = vst [vmem:[#allocation2 + $0x148] sm:$0xff] %v240_v3  ;;  %422 = vst [vmem:[#allocation2 + $0x158] sm:$0xff] %v353_v4  ;;  %v242_v7 = vadd.f32 %v241_v5, %v1087_v32  ;;  %v355_v8 = vadd.f32 %v354_v6, %v1091_v33 }
  0xf6   :  { %v243_v9 = vpop.f32.mrf.mxu0  ;;  %v356_v10 = vpop.f32.mrf.mxu1 }
  0xf7   :  { %423 = vst [vmem:[#allocation2 + $0x160] sm:$0xff] %v242_v7  ;;  %425 = vst [vmem:[#allocation2 + $0x170] sm:$0xff] %v355_v8  ;;  %v244_v11 = vadd.f32 %v243_v9, %v1095_v34  ;;  %v357_v12 = vadd.f32 %v356_v10, %v1099_v35 }
  0xf8   :  { %v247_v13 = vpop.f32.mrf.mxu0  ;;  %v360_v14 = vpop.f32.mrf.mxu1 }
  0xf9   :  { %424 = vst [vmem:[#allocation2 + $0x168] sm:$0xff] %v244_v11  ;;  %426 = vst [vmem:[#allocation2 + $0x178] sm:$0xff] %v357_v12  ;;  %v248_v15 = vadd.f32 %v247_v13, %v1087_v32  ;;  %v361_v16 = vadd.f32 %v360_v14, %v1091_v33 }
  0xfa   :  { %v249_v17 = vpop.f32.mrf.mxu0  ;;  %v362_v18 = vpop.f32.mrf.mxu1 }
  0xfb   :  { %427 = vst [vmem:[#allocation2 + $0x180] sm:$0xff] %v248_v15  ;;  %429 = vst [vmem:[#allocation2 + $0x190] sm:$0xff] %v361_v16  ;;  %v250_v19 = vadd.f32 %v249_v17, %v1095_v34  ;;  %v363_v20 = vadd.f32 %v362_v18, %v1099_v35 }
  0xfc   :  { %v251_v21 = vpop.f32.mrf.mxu0  ;;  %v364_v22 = vpop.f32.mrf.mxu1 }
  0xfd   :  { %428 = vst [vmem:[#allocation2 + $0x188] sm:$0xff] %v250_v19  ;;  %430 = vst [vmem:[#allocation2 + $0x198] sm:$0xff] %v363_v20  ;;  %v252_v23 = vadd.f32 %v251_v21, %v1087_v32  ;;  %v365_v24 = vadd.f32 %v364_v22, %v1091_v33 }
  0xfe   :  { %v253_v25 = vpop.f32.mrf.mxu0  ;;  %v366_v29 = vpop.f32.mrf.mxu1 }
  0xff   :  { %431 = vst [vmem:[#allocation2 + $0x1a0] sm:$0xff] %v252_v23  ;;  %433 = vst [vmem:[#allocation2 + $0x1b0] sm:$0xff] %v365_v24  ;;  %v254_v36 = vadd.f32 %v253_v25, %v1095_v34  ;;  %v367_v37 = vadd.f32 %v366_v29, %v1099_v35 }
 0x100   :  { %v257_v38 = vpop.f32.mrf.mxu0  ;;  %v370_v39 = vpop.f32.mrf.mxu1 }
 0x101   :  { %432 = vst [vmem:[#allocation2 + $0x1a8] sm:$0xff] %v254_v36  ;;  %434 = vst [vmem:[#allocation2 + $0x1b8] sm:$0xff] %v367_v37  ;;  %v258_v40 = vadd.f32 %v257_v38, %v1087_v32  ;;  %v371_v41 = vadd.f32 %v370_v39, %v1091_v33 }
 0x102   :  { %v259_v42 = vpop.f32.mrf.mxu0  ;;  %v372_v43 = vpop.f32.mrf.mxu1 }
 0x103   :  { %435 = vst [vmem:[#allocation2 + $0x1c0] sm:$0xff] %v258_v40  ;;  %437 = vst [vmem:[#allocation2 + $0x1d0] sm:$0xff] %v371_v41  ;;  %v260_v45 = vadd.f32 %v259_v42, %v1095_v34  ;;  %v373_v46 = vadd.f32 %v372_v43, %v1099_v35 }
 0x104   :  { %v261_v47 = vpop.f32.mrf.mxu0  ;;  %v374_v48 = vpop.f32.mrf.mxu1 }
 0x105   :  { %436 = vst [vmem:[#allocation2 + $0x1c8] sm:$0xff] %v260_v45  ;;  %438 = vst [vmem:[#allocation2 + $0x1d8] sm:$0xff] %v373_v46  ;;  %v262_v49 = vadd.f32 %v261_v47, %v1087_v32  ;;  %v375_v50 = vadd.f32 %v374_v48, %v1091_v33  ;;  %v1178_v32 = vrot.slane %v445_v44, %v51_v30 }
 0x106   :  { %v263_v53 = vpop.f32.mrf.mxu0  ;;  %v376_v54 = vpop.f32.mrf.mxu1 }
 0x107   :  { %439 = vst [vmem:[#allocation2 + $0x1e0] sm:$0xff] %v262_v49  ;;  %441 = vst [vmem:[#allocation2 + $0x1f0] sm:$0xff] %v375_v50  ;;  %v264_v55 = vadd.f32 %v263_v53, %v1095_v34  ;;  %v377_v56 = vadd.f32 %v376_v54, %v1099_v35 }
 0x108   :  { %v523_v33 = vpop.f32.mrf.mxu0  ;;  %v636_v28 = vpop.f32.mrf.mxu1 }
 0x109   :  { %440 = vst [vmem:[#allocation2 + $0x1e8] sm:$0xff] %v264_v55  ;;  %442 = vst [vmem:[#allocation2 + $0x1f8] sm:$0xff] %v377_v56  ;;  %v524_v57 = vadd.f32 %v523_v33, %v1168_v51  ;;  %v637_v58 = vadd.f32 %v636_v28, %v1172_v52 }
 0x10a   :  { %v525_v59 = vpop.f32.mrf.mxu0  ;;  %v638_v34 = vpop.f32.mrf.mxu1 }
 0x10b   :  { %895 = shalt.err (!%p892_p4)
}
 0x10c   :  { %s930_s23 = smov 512   ;;  %s931_s24 = smov 32   ;;  %715 = vst [vmem:[#allocation4] sm:$0xff] %v524_v57  ;;  %717 = vst [vmem:[#allocation4 + $0x10] sm:$0xff] %v637_v58  ;;  %v526_v26 = vadd.f32 %v525_v59, %v1178_v32  ;;  %v639_v30 = vadd.f32 %v638_v34, %v1182_v27  ;;  %v527_v31 = vpop.f32.mrf.mxu0  ;;  %v640_v35 = vpop.f32.mrf.mxu1 }
 0x10d   :  { %790 = dma.vmem_to_hbm [thread:$0]  %s785_s22, 8192, %s1265_s5, [#allocation3], %s930_s23, %s930_s23, %s931_s24   ;;  %v528_v60 = vadd.f32 %v527_v31, %v1168_v51  ;;  %v641_v61 = vadd.f32 %v640_v35, %v1172_v52 }
 0x10e   :  { %716 = vst [vmem:[#allocation4 + $0x8] sm:$0xff] %v526_v26  ;;  %718 = vst [vmem:[#allocation4 + $0x18] sm:$0xff] %v639_v30  ;;  %v529_v62 = vpop.f32.mrf.mxu0  ;;  %v642_v63 = vpop.f32.mrf.mxu1  ;;  %s932_s5 = smov [#allocation4]  }
 0x10f   :  { %719 = vst [vmem:[#allocation4 + $0x20] sm:$0xff] %v528_v60  ;;  %721 = vst [vmem:[#allocation4 + $0x30] sm:$0xff] %v641_v61  ;;  %v530_v0 = vadd.f32 %v529_v62, %v1178_v32  ;;  %v643_v1 = vadd.f32 %v642_v63, %v1182_v27  ;;  %s796_s27 = sshll.u32 %s932_s5, 4  ;;  %s797_s27 = int_to_ptr.vmem [resolvable:$true] %s796_s27 }
 0x110   :  { %v533_v2 = vpop.f32.mrf.mxu0  ;;  %v646_v3 = vpop.f32.mrf.mxu1  ;;  %s904_s28 = scalar_lea.vmem %s797_s27, 8192  ;;  %p909_p6 = scmp.lt.s32.totalorder %s797_s27, %s797_s27 }
 0x111   :  { %720 = vst [vmem:[#allocation4 + $0x28] sm:$0xff] %v530_v0  ;;  %722 = vst [vmem:[#allocation4 + $0x38] sm:$0xff] %v643_v1  ;;  %v534_v4 = vadd.f32 %v533_v2, %v1168_v51  ;;  %v647_v5 = vadd.f32 %v646_v3, %v1172_v52  ;;  %p905_p5 = scmp.ne.s32.totalorder %s797_s27, %s904_s28  ;;  %p910_p7 = scmp.lt.s32.totalorder %s904_s28, %s904_s28 }
 0x112   :  { %v535_v6 = vpop.f32.mrf.mxu0  ;;  %v648_v7 = vpop.f32.mrf.mxu1 }
 0x113   :  { %723 = vst [vmem:[#allocation4 + $0x40] sm:$0xff] %v534_v4  ;;  %725 = vst [vmem:[#allocation4 + $0x50] sm:$0xff] %v647_v5  ;;  %v536_v8 = vadd.f32 %v535_v6, %v1178_v32  ;;  %v649_v9 = vadd.f32 %v648_v7, %v1182_v27  ;;  %p911_p8 = por %p910_p7, %p909_p6 }
 0x114   :  { %v537_v10 = vpop.f32.mrf.mxu0  ;;  %v650_v11 = vpop.f32.mrf.mxu1 }
 0x115   :  { %724 = vst [vmem:[#allocation4 + $0x48] sm:$0xff] %v536_v8  ;;  %726 = vst [vmem:[#allocation4 + $0x58] sm:$0xff] %v649_v9  ;;  %v538_v12 = vadd.f32 %v537_v10, %v1168_v51  ;;  %v651_v13 = vadd.f32 %v650_v11, %v1172_v52  ;;  %p912_p9 = pnand %p911_p8, %p905_p5 }
 0x116   :  { %v539_v14 = vpop.f32.mrf.mxu0  ;;  %v652_v15 = vpop.f32.mrf.mxu1 }
 0x117   :  { %727 = vst [vmem:[#allocation4 + $0x60] sm:$0xff] %v538_v12  ;;  %729 = vst [vmem:[#allocation4 + $0x70] sm:$0xff] %v651_v13  ;;  %v540_v16 = vadd.f32 %v539_v14, %v1178_v32  ;;  %v653_v17 = vadd.f32 %v652_v15, %v1182_v27 }
 0x118   :  { %v543_v18 = vpop.f32.mrf.mxu0  ;;  %v656_v19 = vpop.f32.mrf.mxu1 }
 0x119   :  { %728 = vst [vmem:[#allocation4 + $0x68] sm:$0xff] %v540_v16  ;;  %730 = vst [vmem:[#allocation4 + $0x78] sm:$0xff] %v653_v17  ;;  %v544_v20 = vadd.f32 %v543_v18, %v1168_v51  ;;  %v657_v21 = vadd.f32 %v656_v19, %v1172_v52 }
 0x11a   :  { %v545_v22 = vpop.f32.mrf.mxu0  ;;  %v658_v23 = vpop.f32.mrf.mxu1 }
 0x11b   :  { %731 = vst [vmem:[#allocation4 + $0x80] sm:$0xff] %v544_v20  ;;  %733 = vst [vmem:[#allocation4 + $0x90] sm:$0xff] %v657_v21  ;;  %v546_v24 = vadd.f32 %v545_v22, %v1178_v32  ;;  %v659_v25 = vadd.f32 %v658_v23, %v1182_v27 }
 0x11c   :  { %v547_v29 = vpop.f32.mrf.mxu0  ;;  %v660_v36 = vpop.f32.mrf.mxu1 }
 0x11d   :  { %732 = vst [vmem:[#allocation4 + $0x88] sm:$0xff] %v546_v24  ;;  %734 = vst [vmem:[#allocation4 + $0x98] sm:$0xff] %v659_v25  ;;  %v548_v37 = vadd.f32 %v547_v29, %v1168_v51  ;;  %v661_v38 = vadd.f32 %v660_v36, %v1172_v52 }
 0x11e   :  { %v549_v39 = vpop.f32.mrf.mxu0  ;;  %v662_v40 = vpop.f32.mrf.mxu1 }
 0x11f   :  { %735 = vst [vmem:[#allocation4 + $0xa0] sm:$0xff] %v548_v37  ;;  %737 = vst [vmem:[#allocation4 + $0xb0] sm:$0xff] %v661_v38  ;;  %v550_v41 = vadd.f32 %v549_v39, %v1178_v32  ;;  %v663_v42 = vadd.f32 %v662_v40, %v1182_v27 }
 0x120   :  { %v553_v43 = vpop.f32.mrf.mxu0  ;;  %v666_v44 = vpop.f32.mrf.mxu1 }
 0x121   :  { %736 = vst [vmem:[#allocation4 + $0xa8] sm:$0xff] %v550_v41  ;;  %738 = vst [vmem:[#allocation4 + $0xb8] sm:$0xff] %v663_v42  ;;  %v554_v45 = vadd.f32 %v553_v43, %v1168_v51  ;;  %v667_v46 = vadd.f32 %v666_v44, %v1172_v52 }
 0x122   :  { %v555_v47 = vpop.f32.mrf.mxu0  ;;  %v668_v48 = vpop.f32.mrf.mxu1 }
 0x123   :  { %739 = vst [vmem:[#allocation4 + $0xc0] sm:$0xff] %v554_v45  ;;  %741 = vst [vmem:[#allocation4 + $0xd0] sm:$0xff] %v667_v46  ;;  %v556_v49 = vadd.f32 %v555_v47, %v1178_v32  ;;  %v669_v50 = vadd.f32 %v668_v48, %v1182_v27 }
 0x124   :  { %v557_v53 = vpop.f32.mrf.mxu0  ;;  %v670_v54 = vpop.f32.mrf.mxu1 }
 0x125   :  { %740 = vst [vmem:[#allocation4 + $0xc8] sm:$0xff] %v556_v49  ;;  %742 = vst [vmem:[#allocation4 + $0xd8] sm:$0xff] %v669_v50  ;;  %v558_v55 = vadd.f32 %v557_v53, %v1168_v51  ;;  %v671_v56 = vadd.f32 %v670_v54, %v1172_v52 }
 0x126   :  { %v559_v33 = vpop.f32.mrf.mxu0  ;;  %v672_v28 = vpop.f32.mrf.mxu1 }
 0x127   :  { %743 = vst [vmem:[#allocation4 + $0xe0] sm:$0xff] %v558_v55  ;;  %745 = vst [vmem:[#allocation4 + $0xf0] sm:$0xff] %v671_v56  ;;  %v560_v57 = vadd.f32 %v559_v33, %v1178_v32  ;;  %v673_v58 = vadd.f32 %v672_v28, %v1182_v27 }
 0x128   :  { %v563_v59 = vpop.f32.mrf.mxu0  ;;  %v676_v34 = vpop.f32.mrf.mxu1 }
 0x129   :  { %744 = vst [vmem:[#allocation4 + $0xe8] sm:$0xff] %v560_v57  ;;  %746 = vst [vmem:[#allocation4 + $0xf8] sm:$0xff] %v673_v58  ;;  %v564_v26 = vadd.f32 %v563_v59, %v1168_v51  ;;  %v677_v30 = vadd.f32 %v676_v34, %v1172_v52 }
 0x12a   :  { %v565_v31 = vpop.f32.mrf.mxu0  ;;  %v678_v35 = vpop.f32.mrf.mxu1 }
 0x12b   :  { %747 = vst [vmem:[#allocation4 + $0x100] sm:$0xff] %v564_v26  ;;  %749 = vst [vmem:[#allocation4 + $0x110] sm:$0xff] %v677_v30  ;;  %v566_v60 = vadd.f32 %v565_v31, %v1178_v32  ;;  %v679_v61 = vadd.f32 %v678_v35, %v1182_v27 }
 0x12c   :  { %v567_v62 = vpop.f32.mrf.mxu0  ;;  %v680_v63 = vpop.f32.mrf.mxu1 }
 0x12d   :  { %748 = vst [vmem:[#allocation4 + $0x108] sm:$0xff] %v566_v60  ;;  %750 = vst [vmem:[#allocation4 + $0x118] sm:$0xff] %v679_v61  ;;  %v568_v0 = vadd.f32 %v567_v62, %v1168_v51  ;;  %v681_v1 = vadd.f32 %v680_v63, %v1172_v52 }
 0x12e   :  { %v569_v2 = vpop.f32.mrf.mxu0  ;;  %v682_v3 = vpop.f32.mrf.mxu1 }
 0x12f   :  { %751 = vst [vmem:[#allocation4 + $0x120] sm:$0xff] %v568_v0  ;;  %753 = vst [vmem:[#allocation4 + $0x130] sm:$0xff] %v681_v1  ;;  %v570_v4 = vadd.f32 %v569_v2, %v1178_v32  ;;  %v683_v5 = vadd.f32 %v682_v3, %v1182_v27 }
 0x130   :  { %v573_v6 = vpop.f32.mrf.mxu0  ;;  %v686_v7 = vpop.f32.mrf.mxu1 }
 0x131   :  { %752 = vst [vmem:[#allocation4 + $0x128] sm:$0xff] %v570_v4  ;;  %754 = vst [vmem:[#allocation4 + $0x138] sm:$0xff] %v683_v5  ;;  %v574_v8 = vadd.f32 %v573_v6, %v1168_v51  ;;  %v687_v9 = vadd.f32 %v686_v7, %v1172_v52 }
 0x132   :  { %v575_v10 = vpop.f32.mrf.mxu0  ;;  %v688_v11 = vpop.f32.mrf.mxu1 }
 0x133   :  { %755 = vst [vmem:[#allocation4 + $0x140] sm:$0xff] %v574_v8  ;;  %757 = vst [vmem:[#allocation4 + $0x150] sm:$0xff] %v687_v9  ;;  %v576_v12 = vadd.f32 %v575_v10, %v1178_v32  ;;  %v689_v13 = vadd.f32 %v688_v11, %v1182_v27 }
 0x134   :  { %v577_v14 = vpop.f32.mrf.mxu0  ;;  %v690_v15 = vpop.f32.mrf.mxu1 }
 0x135   :  { %756 = vst [vmem:[#allocation4 + $0x148] sm:$0xff] %v576_v12  ;;  %758 = vst [vmem:[#allocation4 + $0x158] sm:$0xff] %v689_v13  ;;  %v578_v16 = vadd.f32 %v577_v14, %v1168_v51  ;;  %v691_v17 = vadd.f32 %v690_v15, %v1172_v52 }
 0x136   :  { %v579_v18 = vpop.f32.mrf.mxu0  ;;  %v692_v19 = vpop.f32.mrf.mxu1 }
 0x137   :  { %759 = vst [vmem:[#allocation4 + $0x160] sm:$0xff] %v578_v16  ;;  %761 = vst [vmem:[#allocation4 + $0x170] sm:$0xff] %v691_v17  ;;  %v580_v20 = vadd.f32 %v579_v18, %v1178_v32  ;;  %v693_v21 = vadd.f32 %v692_v19, %v1182_v27 }
 0x138   :  { %v583_v22 = vpop.f32.mrf.mxu0  ;;  %v696_v23 = vpop.f32.mrf.mxu1 }
 0x139   :  { %760 = vst [vmem:[#allocation4 + $0x168] sm:$0xff] %v580_v20  ;;  %762 = vst [vmem:[#allocation4 + $0x178] sm:$0xff] %v693_v21  ;;  %v584_v24 = vadd.f32 %v583_v22, %v1168_v51  ;;  %v697_v25 = vadd.f32 %v696_v23, %v1172_v52 }
 0x13a   :  { %v585_v29 = vpop.f32.mrf.mxu0  ;;  %v698_v36 = vpop.f32.mrf.mxu1 }
 0x13b   :  { %763 = vst [vmem:[#allocation4 + $0x180] sm:$0xff] %v584_v24  ;;  %765 = vst [vmem:[#allocation4 + $0x190] sm:$0xff] %v697_v25  ;;  %v586_v37 = vadd.f32 %v585_v29, %v1178_v32  ;;  %v699_v38 = vadd.f32 %v698_v36, %v1182_v27 }
 0x13c   :  { %v587_v39 = vpop.f32.mrf.mxu0  ;;  %v700_v40 = vpop.f32.mrf.mxu1 }
 0x13d   :  { %764 = vst [vmem:[#allocation4 + $0x188] sm:$0xff] %v586_v37  ;;  %766 = vst [vmem:[#allocation4 + $0x198] sm:$0xff] %v699_v38  ;;  %v588_v41 = vadd.f32 %v587_v39, %v1168_v51  ;;  %v701_v42 = vadd.f32 %v700_v40, %v1172_v52 }
 0x13e   :  { %v589_v43 = vpop.f32.mrf.mxu0  ;;  %v702_v44 = vpop.f32.mrf.mxu1 }
 0x13f   :  { %767 = vst [vmem:[#allocation4 + $0x1a0] sm:$0xff] %v588_v41  ;;  %769 = vst [vmem:[#allocation4 + $0x1b0] sm:$0xff] %v701_v42  ;;  %v590_v45 = vadd.f32 %v589_v43, %v1178_v32  ;;  %v703_v46 = vadd.f32 %v702_v44, %v1182_v27 }
 0x140   :  { %v593_v47 = vpop.f32.mrf.mxu0  ;;  %v706_v48 = vpop.f32.mrf.mxu1 }
 0x141   :  { %768 = vst [vmem:[#allocation4 + $0x1a8] sm:$0xff] %v590_v45  ;;  %770 = vst [vmem:[#allocation4 + $0x1b8] sm:$0xff] %v703_v46  ;;  %v594_v49 = vadd.f32 %v593_v47, %v1168_v51  ;;  %v707_v50 = vadd.f32 %v706_v48, %v1172_v52 }
 0x142   :  { %v595_v53 = vpop.f32.mrf.mxu0  ;;  %v708_v54 = vpop.f32.mrf.mxu1 }
 0x143   :  { %771 = vst [vmem:[#allocation4 + $0x1c0] sm:$0xff] %v594_v49  ;;  %773 = vst [vmem:[#allocation4 + $0x1d0] sm:$0xff] %v707_v50  ;;  %v596_v55 = vadd.f32 %v595_v53, %v1178_v32  ;;  %v709_v56 = vadd.f32 %v708_v54, %v1182_v27 }
 0x144   :  { %v597_v33 = vpop.f32.mrf.mxu0  ;;  %v710_v28 = vpop.f32.mrf.mxu1 }
 0x145   :  { %772 = vst [vmem:[#allocation4 + $0x1c8] sm:$0xff] %v596_v55  ;;  %774 = vst [vmem:[#allocation4 + $0x1d8] sm:$0xff] %v709_v56  ;;  %v598_v57 = vadd.f32 %v597_v33, %v1168_v51  ;;  %v711_v58 = vadd.f32 %v710_v28, %v1172_v52 }
 0x146   :  { %v599_v59 = vpop.f32.mrf.mxu0  ;;  %v712_v34 = vpop.f32.mrf.mxu1 }
 0x147   :  { %775 = vst [vmem:[#allocation4 + $0x1e0] sm:$0xff] %v598_v57  ;;  %777 = vst [vmem:[#allocation4 + $0x1f0] sm:$0xff] %v711_v58  ;;  %v600_v26 = vadd.f32 %v599_v59, %v1178_v32  ;;  %v713_v30 = vadd.f32 %v712_v34, %v1182_v27 }
 0x149   :  { %776 = vst [vmem:[#allocation4 + $0x1e8] sm:$0xff] %v600_v26  ;;  %778 = vst [vmem:[#allocation4 + $0x1f8] sm:$0xff] %v713_v30 }
 0x14a   :  { %915 = shalt.err (!%p912_p9)
}
 0x14b   :  { %802 = dma.vmem_to_hbm [thread:$0]  %s797_s27, 8192, %s1266_s6, [#allocation5], %s930_s23, %s930_s23, %s931_s24  }
 0x14c   :  { %924 = dma.done.wait [#allocation3], 8192  }
 0x14d   :  { %925 = vsyncadd [#allocation3], 4294959104 }
 0x14e   :  { %926 = dma.done.wait [#allocation5], 8192  }
 0x14f   :  { %927 = vsyncadd [#allocation5], 4294959104 }
 0x150   :  { %809 = vsyncpa [#allocation3], 1 }
 0x151   :  { %810 = vsyncpa [#allocation5], 1 }

</bundles_post_ra>
